<compile_context>
chip_gen: v6e
topology: v6e:2x2x1
jax: 0.10.0
libtpu: 0.0.40
codegen_flags: <defaults>
</compile_context>

<pallas_src>
import jax
import jax.numpy as jnp
from jax.experimental import pallas as pl
from jax.experimental.pallas import tpu as pltpu

_W = 384  # lanes per row = 128 points * 3 interleaved coordinates


def cal_R(angle):
    """Pure-JAX replica of SimilarityTransform3D.cal_R (3x3 rotation)."""
    a, b, c = angle[0], angle[1], angle[2]
    sin_a, cos_a = jnp.sin(a), jnp.cos(a)
    sin_b, cos_b = jnp.sin(b), jnp.cos(b)
    sin_c, cos_c = jnp.sin(c), jnp.cos(c)
    R = jnp.stack([
        jnp.stack([cos_c * cos_b,
                   cos_c * sin_b * sin_a + sin_c * cos_a,
                   -cos_c * sin_b * cos_a + sin_c * sin_a]),
        jnp.stack([-sin_c * cos_b,
                   -sin_c * sin_b * sin_a + cos_c * cos_a,
                   sin_c * sin_b * cos_a + cos_c * sin_a]),
        jnp.stack([sin_b,
                   -cos_b * sin_a,
                   cos_b * cos_a]),
    ])
    return R  # (3, 3)


def _round_up(n, m):
    return ((n + m - 1) // m) * m


def _sim3d_stencil_kernel(coef_ref, x_ref, o_ref):
    # coef_ref: VMEM f32[8, 384].  Rows 0..4 = period-3 masked coefficient
    #           rows K_d for d = -2..2, row 5 = per-lane bias, rows 6..7 pad.
    # x_ref / o_ref: (TILE_M, 384) interleaved-xyz tiles (128 points per row).
    x = x_ref[...].astype(jnp.float32)
    # d = 0 term + bias (sublane-broadcast of (1, 384) coefficient rows).
    acc = coef_ref[2:3, :] * x + coef_ref[5:6, :]
    # d = -2, -1, 1, 2 terms: shifted neighbours via XLU lane rolls.  Row
    # width 384 is a multiple of 3, so wrap-around lanes are always masked
    # out by zeros in the coefficient rows.
    for row, d in ((0, -2), (1, -1), (3, 1), (4, 2)):
        acc = acc + coef_ref[row:row + 1, :] * pltpu.roll(x, (-d) % _W, axis=1)
    o_ref[...] = acc.astype(o_ref.dtype)


def similarity_transform_3d(x, angle, t, s, *, tile_rows=2048):
    """y = s * (x - t) @ cal_R(angle)^T, matching the PyTorch module."""
    orig_shape = x.shape
    orig_dtype = x.dtype
    assert orig_shape[-1] == 3, "last dim must be the xyz coordinate (3)"
    assert tile_rows % 8 == 0

    flat = x.reshape(-1)          # interleaved [x0, y0, z0, x1, y1, z1, ...]
    n_elems = flat.shape[0]       # 3 * N
    assert n_elems > 0

    # --- fold scale & translation into an affine map (f32 scalar glue) -----
    R = cal_R(angle.astype(jnp.float32))                     # (3, 3)
    Rt = R.T                                                 # permute(1, 0)
    s32 = s.astype(jnp.float32).reshape(())
    A = s32 * Rt                                             # y = x @ A + b
    b = -(s32 * (t.astype(jnp.float32).reshape(1, 3) @ Rt)).reshape(3)

    # --- period-3 stencil coefficient table (built once, 12 KiB VMEM) ------
    lane = jnp.arange(_W)
    c = lane % 3                                             # coord index per lane
    rows = []
    for d in (-2, -1, 0, 1, 2):
        k_idx = c + d
        valid = (k_idx >= 0) & (k_idx <= 2)
        rows.append(jnp.where(valid, A[jnp.clip(k_idx, 0, 2), c], 0.0))
    rows.append(b[c])                                        # bias row
    coef = jnp.stack(rows).astype(jnp.float32)               # (6, 384)
    coef = jnp.pad(coef, ((0, 2), (0, 0)))                   # (8, 384), sublane-aligned

    # --- tiling: rows of 128 whole points, balanced tiles, <=8 rows waste --
    m_rows = -(-n_elems // _W)                  # ceil(3N / 384)
    g = -(-m_rows // tile_rows)                 # number of grid steps
    tile_m = _round_up(-(-m_rows // g), 8)      # balanced tile, multiple of 8
    m_pad = g * tile_m
    pad_elems = m_pad * _W - n_elems
    if pad_elems:
        flat = jnp.pad(flat, (0, pad_elems))    # small tail pad only
    xg = flat.reshape(m_pad, _W)

    out = pl.pallas_call(
        _sim3d_stencil_kernel,
        out_shape=jax.ShapeDtypeStruct((m_pad, _W), orig_dtype),
        grid=(g,),
        in_specs=[
            pl.BlockSpec((8, _W), lambda i: (0, 0)),         # coefficient table
            pl.BlockSpec((tile_m, _W), lambda i: (i, 0)),    # point-data tile
        ],
        out_specs=pl.BlockSpec((tile_m, _W), lambda i: (i, 0)),
        compiler_params=pltpu.CompilerParams(
            dimension_semantics=("parallel",),
            vmem_limit_bytes=48 * 1024 * 1024,
        ),
        cost_estimate=pl.CostEstimate(
            flops=10 * m_pad * _W,
            transcendentals=0,
            bytes_accessed=2 * m_pad * _W * jnp.dtype(orig_dtype).itemsize,
        ),
    )(coef, xg)

    # Padded lanes hold bias-only junk; slice them off (reshape is metadata).
    y = out.reshape(-1)[:n_elems].reshape(orig_shape)
    return y


if __name__ == "__main__":
    key = jax.random.PRNGKey(0)
    kx, ka, kt, ks, kx2 = jax.random.split(key, 5)

    # Small deterministic inputs: batch of 2 clouds of 8 points, xyz last.
    x = jax.random.normal(kx, (2, 8, 3), dtype=jnp.float32)
    angle = 0.1 * jax.random.normal(ka, (3,), dtype=jnp.float32)   # nn.Parameter(zeros(3))
    t = 0.1 * jax.random.normal(kt, (1, 3), dtype=jnp.float32)     # nn.Parameter(zeros((1,3)))
    s = jnp.ones((1,), dtype=jnp.float32) + 0.1 * jax.random.normal(ks, (1,), dtype=jnp.float32)

    y = jax.block_until_ready(similarity_transform_3d(x, angle, t, s))

    # Pure-JAX reference for verification.
    y_ref = s * jnp.matmul(x - t, cal_R(angle).T)
    assert y.dtype == x.dtype and y.shape == x.shape
    assert jnp.allclose(y, y_ref, atol=1e-5, rtol=1e-5), "mismatch vs reference"

    # Ragged point count crossing a 128-point row boundary (exercises pad/stencil).
    x2 = jax.random.normal(kx2, (257, 3), dtype=jnp.float32)
    y2 = jax.block_until_ready(similarity_transform_3d(x2, angle, t, s))
    y2_ref = s * jnp.matmul(x2 - t, cal_R(angle).T)
    assert jnp.allclose(y2, y2_ref, atol=1e-5, rtol=1e-5), "mismatch vs reference (ragged)"

    print("KERNEL_OK")
</pallas_src>

<mosaic_0001>
module attributes {stable_mosaic.version = 11 : i64} {
  func.func @_sim3d_stencil_kernel(%arg0: i32, %arg1: memref<8x384xf32, #tpu.memory_space<vmem>>, %arg2: memref<8x384xf32, #tpu.memory_space<vmem>>, %arg3: memref<8x384xf32, #tpu.memory_space<vmem>>) attributes {dimension_semantics = [#tpu.dimension_semantics<parallel>], iteration_bounds = array<i64: 1>, scalar_prefetch = 0 : i64, scratch_operands = 0 : i64, tpu.core_type = #tpu.core_type<tc>, window_params = [{pipeline_mode = #tpu.pipeline_mode<synchronous>, transform_indices = @transform_0, window_bounds = array<i64: 8, 384>}, {transform_indices = @transform_1, window_bounds = array<i64: 8, 384>}, {transform_indices = @transform_2, window_bounds = array<i64: 8, 384>}]} {
    %c0 = arith.constant 0 : index
    %c0_0 = arith.constant 0 : index
    %0 = vector.load %arg2[%c0, %c0_0] : memref<8x384xf32, #tpu.memory_space<vmem>>, vector<8x384xf32>
    %c2 = arith.constant 2 : index
    %c0_1 = arith.constant 0 : index
    %1 = vector.load %arg1[%c2, %c0_1] : memref<8x384xf32, #tpu.memory_space<vmem>>, vector<1x384xf32>
    %2 = vector.broadcast %1 : vector<1x384xf32> to vector<8x384xf32>
    %3 = arith.mulf %2, %0 : vector<8x384xf32>
    %c5 = arith.constant 5 : index
    %c0_2 = arith.constant 0 : index
    %4 = vector.load %arg1[%c5, %c0_2] : memref<8x384xf32, #tpu.memory_space<vmem>>, vector<1x384xf32>
    %5 = vector.broadcast %4 : vector<1x384xf32> to vector<8x384xf32>
    %6 = arith.addf %3, %5 : vector<8x384xf32>
    %c0_3 = arith.constant 0 : index
    %c0_4 = arith.constant 0 : index
    %7 = vector.load %arg1[%c0_3, %c0_4] : memref<8x384xf32, #tpu.memory_space<vmem>>, vector<1x384xf32>
    %c2_i32 = arith.constant 2 : i32
    %8 = tpu.dynamic_rotate %0 by %c2_i32 dim 1 : vector<8x384xf32>, i32 -> vector<8x384xf32>
    %9 = vector.broadcast %7 : vector<1x384xf32> to vector<8x384xf32>
    %10 = arith.mulf %9, %8 : vector<8x384xf32>
    %11 = arith.addf %6, %10 : vector<8x384xf32>
    %c1 = arith.constant 1 : index
    %c0_5 = arith.constant 0 : index
    %12 = vector.load %arg1[%c1, %c0_5] : memref<8x384xf32, #tpu.memory_space<vmem>>, vector<1x384xf32>
    %c1_i32 = arith.constant 1 : i32
    %13 = tpu.dynamic_rotate %0 by %c1_i32 dim 1 : vector<8x384xf32>, i32 -> vector<8x384xf32>
    %14 = vector.broadcast %12 : vector<1x384xf32> to vector<8x384xf32>
    %15 = arith.mulf %14, %13 : vector<8x384xf32>
    %16 = arith.addf %11, %15 : vector<8x384xf32>
    %c3 = arith.constant 3 : index
    %c0_6 = arith.constant 0 : index
    %17 = vector.load %arg1[%c3, %c0_6] : memref<8x384xf32, #tpu.memory_space<vmem>>, vector<1x384xf32>
    %c383_i32 = arith.constant 383 : i32
    %18 = tpu.dynamic_rotate %0 by %c383_i32 dim 1 : vector<8x384xf32>, i32 -> vector<8x384xf32>
    %19 = vector.broadcast %17 : vector<1x384xf32> to vector<8x384xf32>
    %20 = arith.mulf %19, %18 : vector<8x384xf32>
    %21 = arith.addf %16, %20 : vector<8x384xf32>
    %c4 = arith.constant 4 : index
    %c0_7 = arith.constant 0 : index
    %22 = vector.load %arg1[%c4, %c0_7] : memref<8x384xf32, #tpu.memory_space<vmem>>, vector<1x384xf32>
    %c382_i32 = arith.constant 382 : i32
    %23 = tpu.dynamic_rotate %0 by %c382_i32 dim 1 : vector<8x384xf32>, i32 -> vector<8x384xf32>
    %24 = vector.broadcast %22 : vector<1x384xf32> to vector<8x384xf32>
    %25 = arith.mulf %24, %23 : vector<8x384xf32>
    %26 = arith.addf %21, %25 : vector<8x384xf32>
    %c0_8 = arith.constant 0 : index
    %c0_9 = arith.constant 0 : index
    %27 = vector.load %arg3[%c0_8, %c0_9] : memref<8x384xf32, #tpu.memory_space<vmem>>, vector<8x384xf32>
    tpu.vector_store %arg3[%c0_8, %c0_9], %26 {strides = array<i32>} : memref<8x384xf32, #tpu.memory_space<vmem>>, vector<8x384xf32>,
    return
  }
  func.func @transform_0(%arg0: i32) -> (i32, i32) {
    %c0_i32 = arith.constant 0 : i32
    %c0_i32_0 = arith.constant 0 : i32
    %c0_i32_1 = arith.constant 0 : i32
    return %c0_i32, %c0_i32_0 : i32, i32
  }
  func.func @transform_1(%arg0: i32) -> (i32, i32) {
    %c0_i32 = arith.constant 0 : i32
    %c0_i32_0 = arith.constant 0 : i32
    return %arg0, %c0_i32 : i32, i32
  }
  func.func @transform_2(%arg0: i32) -> (i32, i32) {
    %c0_i32 = arith.constant 0 : i32
    %c0_i32_0 = arith.constant 0 : i32
    return %arg0, %c0_i32 : i32, i32
  }
}

</mosaic_0001>

<bundles_post_ra>
// kernel: tpu_custom_call.1
= control target key start
LH: loop header
LB: loop body
LE: loop exit
PB: predicated region body
PF: predicated region fallthrough
CT: control target
= control target key end

     0   :  { %7 = vsyncpa [#allocation3], 0  ;;  %s395_s0 = inlined_call_operand.hbm [shape: f32[8,384], index: 0, kind: input, shape index: {}]   ;;  %s396_s1 = inlined_call_operand.hbm [shape: f32[8,384], index: 1, kind: input, shape index: {}]   ;;  %s397_s2 = inlined_call_operand.hbm [shape: f32[8,384], index: 2, kind: output, shape index: {}]  }
   0x1   :  { %8 = vsyncpa [#allocation6], 0 }
   0x2   :  { %9 = vsyncpa [#allocation4], 0  ;;  %s310_s9 = smov [#allocation2]   ;;  %s311_s11 = smov [#allocation5]  }
   0x3   :  { %s16_s10 = sshll.u32 %s310_s9, 4  ;;  %s26_s12 = sshll.u32 %s311_s11, 4  ;;  %s17_s10 = int_to_ptr.vmem [resolvable:$true] %s16_s10  ;;  %s27_s12 = int_to_ptr.vmem [resolvable:$true] %s26_s12 }
   0x4   :  { %s252_s13 = scalar_lea.vmem %s17_s10, 384  ;;  %p257_p1 = scmp.lt.s32.totalorder %s17_s10, %s17_s10 }
   0x5   :  { %p253_p0 = scmp.ne.s32.totalorder %s17_s10, %s252_s13  ;;  %p258_p2 = scmp.lt.s32.totalorder %s252_s13, %s252_s13 }
   0x7   :  { %p259_p3 = por %p258_p2, %p257_p1 }
   0x9   :  { %p260_p4 = pnand %p259_p3, %p253_p0 }
   0xb   :  { %263 = shalt.err (!%p260_p4)
}
   0xc   :  { %19 = dma.hbm_to_vmem [thread:$0]  %s395_s0, 384, %s17_s10, [#allocation3]  }
   0xd   :  { %s272_s16 = scalar_lea.vmem %s27_s12, 384  ;;  %p277_p6 = scmp.lt.s32.totalorder %s27_s12, %s27_s12 }
   0xe   :  { %p273_p5 = scmp.ne.s32.totalorder %s27_s12, %s272_s16  ;;  %p278_p7 = scmp.lt.s32.totalorder %s272_s16, %s272_s16 }
  0x10   :  { %p279_p8 = por %p278_p7, %p277_p6 }
  0x12   :  { %p280_p9 = pnand %p279_p8, %p273_p5 }
  0x14   :  { %283 = shalt.err (!%p280_p9)
}
  0x15   :  { %29 = dma.hbm_to_vmem [thread:$0]  %s396_s1, 384, %s27_s12, [#allocation6]  }
  0x16   :  { %304 = dma.done.wait [#allocation3], 384  }
  0x17   :  { %305 = vsyncadd [#allocation3], 4294966912 }
  0x18   :  { %306 = dma.done.wait [#allocation6], 384  }
  0x19   :  { %307 = vsyncadd [#allocation6], 4294966912  ;;  %v38_v0 = vld [vmem:[#allocation5 + $0x10] sm:$0xff]  ;;  %v36_v1 = vld [vmem:[#allocation5] sm:$0xff]  ;;  %s312_s19 = smov 2   ;;  %s313_s0 = smov 1   ;;  %v42_v3 = vlaneseq }
  0x1a   :  { %86 = vrot.lane.b32.xlu1 %v38_v0, %s312_s19  ;;  %82 = vrot.lane.b32.xlu0 %v36_v1, %s312_s19  ;;  %v37_v2 = vld [vmem:[#allocation5 + $0x8] sm:$0xff]  ;;  %s314_s20 = smov 127   ;;  %s315_s21 = smov 126  }
  0x1b   :  { %v43_v4 = vshrl.u32 %v42_v3, 7  ;;  %v40_v7 = vld [vmem:[#allocation2 + $0x2] ss:$8 sm:$0x7]  ;;  %v344_v11 = vand.u32 127, %v42_v3  ;;  %s316_s1 = smov [#allocation7]  }
  0x1c   :  { %v61_v13 = vld [vmem:[#allocation2 + $0x5] ss:$8 sm:$0x7]  ;;  %v81_v17 = vld [vmem:[#allocation2] ss:$8 sm:$0x7] }
  0x1d   :  { %v338_v5 = vsub.s32 0, %v43_v4  ;;  %v340_v8 = vsub.s32 1, %v43_v4  ;;  %v342_v10 = vsub.s32 2, %v43_v4  ;;  %vm90_vm0 = vcmp.lt.s32.totalorder %v344_v11, 2  ;;  %s227_s22 = sshll.u32 %s316_s1, 4  ;;  %s228_s22 = int_to_ptr.vmem [resolvable:$true] %s227_s22 }
  0x1e   :  { %118 = vrot.lane.b32.xlu1 %v36_v1, %s313_s0  ;;  %84 = vrot.lane.b32.xlu0 %v37_v2, %s312_s19  ;;  %v117_v21 = vld [vmem:[#allocation2 + $0x1] ss:$8 sm:$0x7]  ;;  %vm124_vm1 = vcmp.lt.s32.totalorder %v344_v11, 1  ;;  %vm158_vm2 = vcmp.lt.s32.totalorder %v344_v11, 127  ;;  %vm192_vm3 = vcmp.lt.s32.totalorder %v344_v11, 126  ;;  %p289_p11 = scmp.lt.s32.totalorder %s228_s22, %s228_s22 }
  0x1f   :  { %v45_v12 = vrot.slane %v40_v7, %v338_v5  ;;  %v49_v15 = vrot.slane %v40_v7, %v340_v8  ;;  %v53_v18 = vrot.slane %v40_v7, %v342_v10  ;;  %v66_v19 = vrot.slane %v61_v13, %v338_v5  ;;  %v151_v31 = vld [vmem:[#allocation2 + $0x3] ss:$8 sm:$0x7]  ;;  %v185_v46 = vld [vmem:[#allocation2 + $0x4] ss:$8 sm:$0x7] }
  0x20   :  { %v98_v22 = vrot.slane %v81_v17, %v338_v5  ;;  %v70_v24 = vrot.slane %v61_v13, %v340_v8  ;;  %v74_v29 = vrot.slane %v61_v13, %v342_v10  ;;  %v102_v30 = vrot.slane %v81_v17, %v340_v8  ;;  %s284_s23 = scalar_lea.vmem %s228_s22, 384 }
  0x21   :  { %v57_v20 = vmul.f32 %v45_v12, %v36_v1  ;;  %v58_v23 = vmul.f32 %v49_v15, %v37_v2  ;;  %v59_v28 = vmul.f32 %v53_v18, %v38_v0  ;;  %v106_v32 = vrot.slane %v81_v17, %v342_v10  ;;  %p285_p10 = scmp.ne.s32.totalorder %s228_s22, %s284_s23  ;;  %p290_p12 = scmp.lt.s32.totalorder %s284_s23, %s284_s23 }
  0x22   :  { %122 = vrot.lane.b32.xlu1 %v38_v0, %s313_s0  ;;  %120 = vrot.lane.b32.xlu0 %v37_v2, %s313_s0  ;;  %v132_v34 = vrot.slane %v117_v21, %v338_v5  ;;  %v136_v35 = vrot.slane %v117_v21, %v340_v8  ;;  %v140_v39 = vrot.slane %v117_v21, %v342_v10 }
  0x23   :  { %v78_v36 = vadd.f32 %v66_v19, %v57_v20  ;;  %v79_v41 = vadd.f32 %v70_v24, %v58_v23  ;;  %v166_v44 = vrot.slane %v151_v31, %v338_v5  ;;  %v80_v47 = vadd.f32 %v74_v29, %v59_v28  ;;  %p291_p13 = por %p290_p12, %p289_p11 }
  0x24   :  { %v170_v53 = vrot.slane %v151_v31, %v340_v8  ;;  %v174_v54 = vrot.slane %v151_v31, %v342_v10  ;;  %v208_v56 = vrot.slane %v185_v46, %v342_v10  ;;  %v200_v62 = vrot.slane %v185_v46, %v338_v5 }
  0x25   :  { %p292_p0 = pnand %p291_p13, %p285_p10 }
  0x26   :  { %154 = vrot.lane.b32.xlu1 %v37_v2, %s314_s20  ;;  %152 = vrot.lane.b32.xlu0 %v36_v1, %s314_s20 }
  0x2a   :  { %186 = vrot.lane.b32.xlu1 %v36_v1, %s315_s21  ;;  %156 = vrot.lane.b32.xlu0 %v38_v0, %s314_s20 }
  0x2e   :  { %190 = vrot.lane.b32.xlu1 %v38_v0, %s315_s21  ;;  %188 = vrot.lane.b32.xlu0 %v37_v2, %s315_s21  ;;  %v204_v2 = vrot.slane %v185_v46, %v340_v8 }
  0x8c   :  { %v87_v6 = vpop.permute.xlu1 %86  ;;  %v83_v9 = vpop.permute.xlu0 %82 }
  0x8d   :  { %v93_v27 = vsel %vm90_vm0, %v87_v6, %v83_v9 }
  0x8e   :  { %v110_v40 = vmul.f32 %v98_v22, %v93_v27 }
  0x90   :  { %v119_v14 = vpop.permute.xlu1 %118  ;;  %v85_v16 = vpop.permute.xlu0 %84  ;;  %v113_v57 = vadd.f32 %v110_v40, %v78_v36 }
  0x91   :  { %v92_v33 = vsel %vm90_vm0, %v83_v9, %v85_v16  ;;  %v91_v37 = vsel %vm90_vm0, %v85_v16, %v87_v6 }
  0x92   :  { %v111_v48 = vmul.f32 %v102_v30, %v92_v33  ;;  %v112_v51 = vmul.f32 %v106_v32, %v91_v37 }
  0x94   :  { %v123_v25 = vpop.permute.xlu1 %122  ;;  %v121_v26 = vpop.permute.xlu0 %120  ;;  %v114_v63 = vadd.f32 %v111_v48, %v79_v41  ;;  %v115_v3 = vadd.f32 %v112_v51, %v80_v47 }
  0x95   :  { %v127_v38 = vsel %vm124_vm1, %v123_v25, %v119_v14  ;;  %v126_v42 = vsel %vm124_vm1, %v119_v14, %v121_v26  ;;  %v125_v49 = vsel %vm124_vm1, %v121_v26, %v123_v25 }
  0x96   :  { %v144_v52 = vmul.f32 %v132_v34, %v127_v38  ;;  %v145_v55 = vmul.f32 %v136_v35, %v126_v42  ;;  %v146_v58 = vmul.f32 %v140_v39, %v125_v49 }
  0x98   :  { %v155_v43 = vpop.permute.xlu1 %154  ;;  %v153_v45 = vpop.permute.xlu0 %152  ;;  %v147_v4 = vadd.f32 %v144_v52, %v113_v57  ;;  %v148_v9 = vadd.f32 %v145_v55, %v114_v63  ;;  %v149_v10 = vadd.f32 %v146_v58, %v115_v3 }
  0x99   :  { %v160_v50 = vsel %vm158_vm2, %v153_v45, %v155_v43 }
  0x9a   :  { %v178_v59 = vmul.f32 %v166_v44, %v160_v50 }
  0x9c   :  { %v187_v60 = vpop.permute.xlu1 %186  ;;  %v157_v61 = vpop.permute.xlu0 %156  ;;  %v181_v12 = vadd.f32 %v178_v59, %v147_v4 }
  0x9d   :  { %v159_v0 = vsel %vm158_vm2, %v155_v43, %v157_v61  ;;  %v161_v1 = vsel %vm158_vm2, %v157_v61, %v153_v45 }
  0x9e   :  { %v179_v6 = vmul.f32 %v170_v53, %v159_v0  ;;  %v180_v7 = vmul.f32 %v174_v54, %v161_v1 }
  0xa0   :  { %v191_v13 = vpop.permute.xlu1 %190  ;;  %v189_v14 = vpop.permute.xlu0 %188  ;;  %v182_v15 = vadd.f32 %v179_v6, %v148_v9  ;;  %v183_v8 = vadd.f32 %v180_v7, %v149_v10 }
  0xa1   :  { %v195_v5 = vsel %vm192_vm3, %v191_v13, %v187_v60  ;;  %v193_v16 = vsel %vm192_vm3, %v189_v14, %v191_v13  ;;  %v194_v17 = vsel %vm192_vm3, %v187_v60, %v189_v14 }
  0xa2   :  { %v214_v18 = vmul.f32 %v208_v56, %v195_v5  ;;  %v212_v19 = vmul.f32 %v200_v62, %v194_v17  ;;  %v213_v20 = vmul.f32 %v204_v2, %v193_v16 }
  0xa4   :  { %v217_v21 = vadd.f32 %v214_v18, %v183_v8  ;;  %v215_v22 = vadd.f32 %v212_v19, %v181_v12  ;;  %v216_v23 = vadd.f32 %v213_v20, %v182_v15 }
  0xa6   :  { %220 = vst [vmem:[#allocation7 + $0x10] sm:$0xff] %v217_v21  ;;  %218 = vst [vmem:[#allocation7] sm:$0xff] %v215_v22 }
  0xa7   :  { %219 = vst [vmem:[#allocation7 + $0x8] sm:$0xff] %v216_v23 }
  0xa8   :  { %295 = shalt.err (!%p292_p0)
}
  0xa9   :  { %230 = dma.vmem_to_hbm [thread:$0]  %s228_s22, 384, %s397_s2, [#allocation4]  }
  0xaa   :  { %308 = dma.done.wait [#allocation4], 384  }
  0xab   :  { %309 = vsyncadd [#allocation4], 4294966912 }
  0xac   :  { %234 = vsyncpa [#allocation3], 1 }
  0xad   :  { %235 = vsyncpa [#allocation6], 1 }
  0xae   :  { %236 = vsyncpa [#allocation4], 1 }

</bundles_post_ra>
